<compile_context>
chip_gen: v6e
topology: v6e:2x2x1
jax: 0.10.0
libtpu: 0.0.40
codegen_flags: <defaults>
</compile_context>

<pallas_src>
import jax
import jax.numpy as jnp
from jax.experimental import pallas as pl
from jax.experimental.pallas import tpu as pltpu


# ---------------------------------------------------------------------------
# Kernel
# ---------------------------------------------------------------------------
def policy_mlp_kernel(x_ref, w1_ref, b1_ref, w2_ref, b2_ref, w3_ref, b3_ref,
                      out_ref):
    """Fused MLP forward: relu(relu(x@W1+b1)@W2+b2)@W3+b3 (bf16 MXU, f32 acc)."""
    x = x_ref[...].astype(jnp.bfloat16)                       # in-kernel cast
    h1 = jnp.dot(x, w1_ref[...], preferred_element_type=jnp.float32) + b1_ref[...]
    h1 = jnp.maximum(h1, 0.0).astype(jnp.bfloat16)
    h2 = jnp.dot(h1, w2_ref[...], preferred_element_type=jnp.float32) + b2_ref[...]
    h2 = jnp.maximum(h2, 0.0).astype(jnp.bfloat16)
    logits = jnp.dot(h2, w3_ref[...], preferred_element_type=jnp.float32) + b3_ref[...]
    out_ref[...] = logits.astype(out_ref.dtype)               # bf16 store


# ---------------------------------------------------------------------------
# Helpers
# ---------------------------------------------------------------------------
def _round_up(x, m):
    return ((x + m - 1) // m) * m


def _ceil_div(a, b):
    return -(-a // b)


_MIN_TB = 16  # bf16 sublane packing granularity for the cast activations


def _choose_batch_tile(batch, block_batch):
    """Batch tile: multiple of 16, right-sized to the batch, >=2 tiles when possible."""
    if batch <= _MIN_TB:
        return _MIN_TB
    # >= 2 tiles whenever there is enough work: (a) lets ("parallel",) shard
    # grid steps across v7x's two TensorCores, (b) keeps ragged-tail waste
    # small instead of padding up to a full block_batch.
    n_tiles = max(_ceil_div(batch, block_batch), 2)
    return _round_up(_ceil_div(batch, n_tiles), _MIN_TB)


def prepare_params(params):
    """One-time parameter prep (hoisted out of the forward path).

    `params` = (w1, b1, w2, b2, w3, b3); weights stored [in_features,
    out_features] (nn.Linear.weight.T), biases of shape (out,) or (1, out).
    Pads hidden/action dims to multiples of 128 (lane-dense) and casts weights
    to bf16, biases to f32.  Call once per parameter update and reuse.
    """
    w1, b1, w2, b2, w3, b3 = params
    state_dim, hidden_dim = w1.shape
    action_dim = w3.shape[1]
    hp = _round_up(hidden_dim, 128)
    ap = _round_up(action_dim, 128)

    def pad_w(w, rows, cols):
        out = jnp.zeros((rows, cols), jnp.bfloat16)
        return out.at[: w.shape[0], : w.shape[1]].set(w.astype(jnp.bfloat16))

    def pad_b(b, cols):
        b = jnp.asarray(b, jnp.float32).reshape(1, -1)   # accept (out,) or (1, out)
        out = jnp.zeros((1, cols), jnp.float32)
        return out.at[:, : b.shape[1]].set(b)

    return (
        pad_w(w1, state_dim, hp), pad_b(b1, hp),
        pad_w(w2, hp, hp),        pad_b(b2, hp),
        pad_w(w3, hp, ap),        pad_b(b3, ap),
    )


# ---------------------------------------------------------------------------
# Forward wrapper
# ---------------------------------------------------------------------------
def policy_network_forward(state, prepared_params, action_dim, *,
                           block_batch=512, slice_output=True):
    """Fused MLP forward over `state` using pre-padded/cast parameters."""
    w1p, b1p, w2p, b2p, w3p, b3p = prepared_params
    batch, state_dim = state.shape
    assert w1p.shape[0] == state_dim, "prepared params do not match state_dim"
    hp = w1p.shape[1]
    ap = w3p.shape[1]

    tb = _choose_batch_tile(batch, block_batch)
    if batch < tb:
        # Tiny-batch path only: pad rows so the single block fits the array.
        state = jnp.zeros((tb, state_dim), state.dtype).at[:batch].set(state)
    rows = state.shape[0]
    grid = (_ceil_div(rows, tb),)

    # Resident blocks (constant index_map) are fetched once; single-buffer them
    # so the pipeline does not reserve 2x their VMEM.
    resident = pl.Buffered(1)

    # Raise the scoped-VMEM cap only when resident params + stream buffers
    # approach the smallest default budget (v5e: 16 MiB); None -> default.
    resident_bytes = sum(int(p.size) * p.dtype.itemsize for p in prepared_params)
    stream_bytes = 2 * (tb * state_dim * state.dtype.itemsize + tb * ap * 2)
    vmem_needed = resident_bytes + stream_bytes + (4 << 20)
    vmem_limit = vmem_needed if vmem_needed > (12 << 20) else None

    out = pl.pallas_call(
        policy_mlp_kernel,
        out_shape=jax.ShapeDtypeStruct((rows, ap), jnp.bfloat16),
        grid_spec=pltpu.PrefetchScalarGridSpec(
            num_scalar_prefetch=0,
            grid=grid,
            in_specs=[
                # x: tiled over batch, raw f32, last dim == full state_dim.
                pl.BlockSpec((tb, state_dim), lambda i: (i, 0)),
                # Weights / biases: VMEM-resident, single-buffered.
                pl.BlockSpec((state_dim, hp), lambda i: (0, 0), pipeline_mode=resident),
                pl.BlockSpec((1, hp),         lambda i: (0, 0), pipeline_mode=resident),
                pl.BlockSpec((hp, hp),        lambda i: (0, 0), pipeline_mode=resident),
                pl.BlockSpec((1, hp),         lambda i: (0, 0), pipeline_mode=resident),
                pl.BlockSpec((hp, ap),        lambda i: (0, 0), pipeline_mode=resident),
                pl.BlockSpec((1, ap),         lambda i: (0, 0), pipeline_mode=resident),
            ],
            out_specs=pl.BlockSpec((tb, ap), lambda i: (i, 0)),
        ),
        compiler_params=pltpu.CompilerParams(
            dimension_semantics=("parallel",),   # v7x: shard batch tiles over 2 TCs
            vmem_limit_bytes=vmem_limit,
        ),
    )(state, w1p, b1p, w2p, b2p, w3p, b3p)

    if not slice_output:
        # Let the consumer fuse its own slice/cast instead of paying a
        # standalone XLA slice over the padded output.
        return out
    # Module semantics: (batch, action_dim) f32 logits.  The slice is tiny;
    # fuse this whole function under jax.jit in the caller for best results.
    return out[:batch, :action_dim].astype(jnp.float32)


# ---------------------------------------------------------------------------
# Init + pure-JAX reference
# ---------------------------------------------------------------------------
def init_params(key, state_dim, action_dim, hidden_dim):
    """Deterministic init mimicking nn.Linear's U(-1/sqrt(fan_in), 1/sqrt(fan_in))."""
    ks = jax.random.split(key, 6)

    def linear(kw, kb, fan_in, fan_out):
        bound = 1.0 / jnp.sqrt(jnp.float32(fan_in))
        # stored as [in, out] so the kernel computes x @ W; bias is 1-D like nn.Linear
        w = jax.random.uniform(kw, (fan_in, fan_out), jnp.float32, -bound, bound)
        b = jax.random.uniform(kb, (fan_out,), jnp.float32, -bound, bound)
        return w, b

    w1, b1 = linear(ks[0], ks[1], state_dim, hidden_dim)
    w2, b2 = linear(ks[2], ks[3], hidden_dim, hidden_dim)
    w3, b3 = linear(ks[4], ks[5], hidden_dim, action_dim)
    return (w1, b1, w2, b2, w3, b3)


def reference_forward(state, params):
    w1, b1, w2, b2, w3, b3 = params
    h1 = jnp.maximum(state @ w1 + b1, 0.0)
    h2 = jnp.maximum(h1 @ w2 + b2, 0.0)
    return h2 @ w3 + b3


if __name__ == "__main__":
    # Small shapes consistent with the module's forward.
    batch, state_dim, action_dim, hidden_dim = 2, 16, 8, 32

    key = jax.random.PRNGKey(0)
    k_state, k_params = jax.random.split(key)

    state = jax.random.normal(k_state, (batch, state_dim), jnp.float32)
    params = init_params(k_params, state_dim, action_dim, hidden_dim)

    # One-time parameter prep (hoisted out of the per-call path per review).
    prepped = prepare_params(params)

    logits = policy_network_forward(state, prepped, action_dim)
    logits = jax.block_until_ready(logits)

    ref = reference_forward(state, params)
    assert logits.shape == (batch, action_dim)
    assert logits.dtype == jnp.float32
    # bf16 weights/activations/logits with f32 accumulation vs. the pure-f32
    # reference; tolerance tightened from 5e-2 to 2e-2 per review.
    assert jnp.allclose(logits, ref, atol=2e-2, rtol=2e-2)

    print("KERNEL_OK")
</pallas_src>

<mosaic_0001>
module attributes {stable_mosaic.version = 11 : i64} {
  func.func @policy_mlp_kernel(%arg0: i32, %arg1: memref<16x16xf32, #tpu.memory_space<vmem>>, %arg2: memref<16x128xbf16, #tpu.memory_space<vmem>>, %arg3: memref<1x128xf32, #tpu.memory_space<vmem>>, %arg4: memref<128x128xbf16, #tpu.memory_space<vmem>>, %arg5: memref<1x128xf32, #tpu.memory_space<vmem>>, %arg6: memref<128x128xbf16, #tpu.memory_space<vmem>>, %arg7: memref<1x128xf32, #tpu.memory_space<vmem>>, %arg8: memref<16x128xbf16, #tpu.memory_space<vmem>>) attributes {dimension_semantics = [#tpu.dimension_semantics<parallel>], iteration_bounds = array<i64: 1>, scalar_prefetch = 0 : i64, scratch_operands = 0 : i64, tpu.core_type = #tpu.core_type<tc>, window_params = [{transform_indices = @transform_0, window_bounds = array<i64: 16, 16>}, {pipeline_mode = #tpu.pipeline_mode<synchronous>, transform_indices = @transform_1, window_bounds = array<i64: 16, 128>}, {pipeline_mode = #tpu.pipeline_mode<synchronous>, transform_indices = @transform_2, window_bounds = array<i64: 1, 128>}, {pipeline_mode = #tpu.pipeline_mode<synchronous>, transform_indices = @transform_3, window_bounds = array<i64: 128, 128>}, {pipeline_mode = #tpu.pipeline_mode<synchronous>, transform_indices = @transform_4, window_bounds = array<i64: 1, 128>}, {pipeline_mode = #tpu.pipeline_mode<synchronous>, transform_indices = @transform_5, window_bounds = array<i64: 128, 128>}, {pipeline_mode = #tpu.pipeline_mode<synchronous>, transform_indices = @transform_6, window_bounds = array<i64: 1, 128>}, {transform_indices = @transform_7, window_bounds = array<i64: 16, 128>}]} {
    %c0 = arith.constant 0 : index
    %c0_0 = arith.constant 0 : index
    %0 = vector.load %arg1[%c0, %c0_0] : memref<16x16xf32, #tpu.memory_space<vmem>>, vector<16x16xf32>
    %1 = arith.truncf %0 : vector<16x16xf32> to vector<16x16xbf16>
    %c0_1 = arith.constant 0 : index
    %c0_2 = arith.constant 0 : index
    %2 = vector.load %arg2[%c0_1, %c0_2] : memref<16x128xbf16, #tpu.memory_space<vmem>>, vector<16x128xbf16>
    %cst = arith.constant dense<0.000000e+00> : vector<16x128xf32>
    %3 = tpu.matmul %1, %2, %cst {dimension_numbers = #tpu.dot_dimension_numbers<[1], [0], [0], [1], [0, 0, 1, 1], [], []>} : vector<16x16xbf16>, vector<16x128xbf16>, vector<16x128xf32> -> vector<16x128xf32>
    %c0_3 = arith.constant 0 : index
    %c0_4 = arith.constant 0 : index
    %4 = vector.load %arg3[%c0_3, %c0_4] : memref<1x128xf32, #tpu.memory_space<vmem>>, vector<1x128xf32>
    %5 = vector.broadcast %4 : vector<1x128xf32> to vector<16x128xf32>
    %6 = arith.addf %3, %5 : vector<16x128xf32>
    %cst_5 = arith.constant 0.000000e+00 : f32
    %7 = vector.broadcast %cst_5 : f32 to vector<16x128xf32>
    %8 = arith.maximumf %6, %7 : vector<16x128xf32>
    %9 = arith.truncf %8 : vector<16x128xf32> to vector<16x128xbf16>
    %c0_6 = arith.constant 0 : index
    %c0_7 = arith.constant 0 : index
    %10 = vector.load %arg4[%c0_6, %c0_7] : memref<128x128xbf16, #tpu.memory_space<vmem>>, vector<128x128xbf16>
    %cst_8 = arith.constant dense<0.000000e+00> : vector<16x128xf32>
    %11 = tpu.matmul %9, %10, %cst_8 {dimension_numbers = #tpu.dot_dimension_numbers<[1], [0], [0], [1], [0, 0, 1, 1], [], []>} : vector<16x128xbf16>, vector<128x128xbf16>, vector<16x128xf32> -> vector<16x128xf32>
    %c0_9 = arith.constant 0 : index
    %c0_10 = arith.constant 0 : index
    %12 = vector.load %arg5[%c0_9, %c0_10] : memref<1x128xf32, #tpu.memory_space<vmem>>, vector<1x128xf32>
    %13 = vector.broadcast %12 : vector<1x128xf32> to vector<16x128xf32>
    %14 = arith.addf %11, %13 : vector<16x128xf32>
    %cst_11 = arith.constant 0.000000e+00 : f32
    %15 = vector.broadcast %cst_11 : f32 to vector<16x128xf32>
    %16 = arith.maximumf %14, %15 : vector<16x128xf32>
    %17 = arith.truncf %16 : vector<16x128xf32> to vector<16x128xbf16>
    %c0_12 = arith.constant 0 : index
    %c0_13 = arith.constant 0 : index
    %18 = vector.load %arg6[%c0_12, %c0_13] : memref<128x128xbf16, #tpu.memory_space<vmem>>, vector<128x128xbf16>
    %cst_14 = arith.constant dense<0.000000e+00> : vector<16x128xf32>
    %19 = tpu.matmul %17, %18, %cst_14 {dimension_numbers = #tpu.dot_dimension_numbers<[1], [0], [0], [1], [0, 0, 1, 1], [], []>} : vector<16x128xbf16>, vector<128x128xbf16>, vector<16x128xf32> -> vector<16x128xf32>
    %c0_15 = arith.constant 0 : index
    %c0_16 = arith.constant 0 : index
    %20 = vector.load %arg7[%c0_15, %c0_16] : memref<1x128xf32, #tpu.memory_space<vmem>>, vector<1x128xf32>
    %21 = vector.broadcast %20 : vector<1x128xf32> to vector<16x128xf32>
    %22 = arith.addf %19, %21 : vector<16x128xf32>
    %23 = arith.truncf %22 : vector<16x128xf32> to vector<16x128xbf16>
    %c0_17 = arith.constant 0 : index
    %c0_18 = arith.constant 0 : index
    %24 = vector.load %arg8[%c0_17, %c0_18] : memref<16x128xbf16, #tpu.memory_space<vmem>>, vector<16x128xbf16>
    tpu.vector_store %arg8[%c0_17, %c0_18], %23 {strides = array<i32>} : memref<16x128xbf16, #tpu.memory_space<vmem>>, vector<16x128xbf16>,
    return
  }
  func.func @transform_0(%arg0: i32) -> (i32, i32) {
    %c0_i32 = arith.constant 0 : i32
    %c0_i32_0 = arith.constant 0 : i32
    return %arg0, %c0_i32 : i32, i32
  }
  func.func @transform_1(%arg0: i32) -> (i32, i32) {
    %c0_i32 = arith.constant 0 : i32
    %c0_i32_0 = arith.constant 0 : i32
    %c0_i32_1 = arith.constant 0 : i32
    return %c0_i32, %c0_i32_0 : i32, i32
  }
  func.func @transform_2(%arg0: i32) -> (i32, i32) {
    %c0_i32 = arith.constant 0 : i32
    %c0_i32_0 = arith.constant 0 : i32
    %c0_i32_1 = arith.constant 0 : i32
    return %c0_i32, %c0_i32_0 : i32, i32
  }
  func.func @transform_3(%arg0: i32) -> (i32, i32) {
    %c0_i32 = arith.constant 0 : i32
    %c0_i32_0 = arith.constant 0 : i32
    %c0_i32_1 = arith.constant 0 : i32
    return %c0_i32, %c0_i32_0 : i32, i32
  }
  func.func @transform_4(%arg0: i32) -> (i32, i32) {
    %c0_i32 = arith.constant 0 : i32
    %c0_i32_0 = arith.constant 0 : i32
    %c0_i32_1 = arith.constant 0 : i32
    return %c0_i32, %c0_i32_0 : i32, i32
  }
  func.func @transform_5(%arg0: i32) -> (i32, i32) {
    %c0_i32 = arith.constant 0 : i32
    %c0_i32_0 = arith.constant 0 : i32
    %c0_i32_1 = arith.constant 0 : i32
    return %c0_i32, %c0_i32_0 : i32, i32
  }
  func.func @transform_6(%arg0: i32) -> (i32, i32) {
    %c0_i32 = arith.constant 0 : i32
    %c0_i32_0 = arith.constant 0 : i32
    %c0_i32_1 = arith.constant 0 : i32
    return %c0_i32, %c0_i32_0 : i32, i32
  }
  func.func @transform_7(%arg0: i32) -> (i32, i32) {
    %c0_i32 = arith.constant 0 : i32
    %c0_i32_0 = arith.constant 0 : i32
    return %arg0, %c0_i32 : i32, i32
  }
}

</mosaic_0001>

<bundles_post_ra>
// kernel: tpu_custom_call.1
= control target key start
LH: loop header
LB: loop body
LE: loop exit
PB: predicated region body
PF: predicated region fallthrough
CT: control target
= control target key end

     0   :  { %12 = vsyncpa [#allocation3], 0  ;;  %s747_s0 = inlined_call_operand.hbm [shape: f32[16,16], index: 0, kind: input, shape index: {}]   ;;  %s748_s1 = inlined_call_operand.hbm [shape: bf16[16,128], index: 1, kind: input, shape index: {}]   ;;  %s749_s2 = inlined_call_operand.vmem [shape: f32[1,128], index: 2, kind: input, shape index: {}]   ;;  %s750_s3 = inlined_call_operand.hbm [shape: bf16[128,128], index: 3, kind: input, shape index: {}]   ;;  %s751_s4 = inlined_call_operand.vmem [shape: f32[1,128], index: 4, kind: input, shape index: {}]   ;;  %s752_s5 = inlined_call_operand.hbm [shape: bf16[128,128], index: 5, kind: input, shape index: {}]   ;;  %s753_s6 = inlined_call_operand.vmem [shape: f32[1,128], index: 6, kind: input, shape index: {}]   ;;  %s754_s7 = inlined_call_operand.hbm [shape: bf16[16,128], index: 7, kind: output, shape index: {}]  }
   0x1   :  { %13 = vsyncpa [#allocation6], 0 }
   0x2   :  { %14 = vsyncpa [#allocation9], 0 }
   0x3   :  { %15 = vsyncpa [#allocation4], 0  ;;  %s637_s24 = smov [#allocation5]  }
   0x4   :  { %s33_s25 = sshll.u32 %s637_s24, 4  ;;  %s34_s25 = int_to_ptr.vmem [resolvable:$true] %s33_s25 }
   0x5   :  { %s537_s26 = scalar_lea.vmem %s34_s25, 128  ;;  %p542_p1 = scmp.lt.s32.totalorder %s34_s25, %s34_s25 }
   0x6   :  { %p538_p0 = scmp.ne.s32.totalorder %s34_s25, %s537_s26  ;;  %p543_p2 = scmp.lt.s32.totalorder %s537_s26, %s537_s26 }
   0x8   :  { %p544_p3 = por %p543_p2, %p542_p1 }
   0xa   :  { %p545_p4 = pnand %p544_p3, %p538_p0 }
   0xc   :  { %548 = shalt.err (!%p545_p4)
}
   0xd   :  { %s638_s27 = smov 64   ;;  %s639_s28 = smov 4  }
   0xe   :  { %39 = dma.hbm_to_vmem [thread:$0]  %s748_s1, 128, %s34_s25, [#allocation6], %s638_s27, %s638_s27, %s639_s28  }
   0xf   :  { %s640_s8 = smov [#allocation2]  }
  0x10   :  { %s21_s9 = sshll.u32 %s640_s8, 4  ;;  %s22_s9 = int_to_ptr.vmem [resolvable:$true] %s21_s9 }
  0x11   :  { %s557_s10 = scalar_lea.vmem %s22_s9, 256  ;;  %p562_p6 = scmp.lt.s32.totalorder %s22_s9, %s22_s9 }
  0x12   :  { %p558_p5 = scmp.ne.s32.totalorder %s22_s9, %s557_s10  ;;  %p563_p7 = scmp.lt.s32.totalorder %s557_s10, %s557_s10 }
  0x14   :  { %p564_p8 = por %p563_p7, %p562_p6 }
  0x16   :  { %p565_p9 = pnand %p564_p8, %p558_p5 }
  0x18   :  { %568 = shalt.err (!%p565_p9)
}
  0x19   :  { %s641_s11 = smov 128   ;;  %s642_s12 = smov 8  }
  0x1a   :  { %27 = dma.hbm_to_vmem [thread:$0]  %s747_s0, 256, %s22_s9, [#allocation3], %s641_s11, %s641_s11, %s642_s12  }
  0x1b   :  { %s643_s15 = smov [#allocation7]   ;;  %s644_s17 = smov [#allocation8]  }
  0x1c   :  { %s47_s16 = sshll.u32 %s643_s15, 4  ;;  %s61_s1 = sshll.u32 %s644_s17, 4  ;;  %s48_s16 = int_to_ptr.vmem [resolvable:$true] %s47_s16  ;;  %s62_s1 = int_to_ptr.vmem [resolvable:$true] %s61_s1 }
  0x1d   :  { %s577_s18 = scalar_lea.vmem %s48_s16, 1024  ;;  %p582_p11 = scmp.lt.s32.totalorder %s48_s16, %s48_s16 }
  0x1e   :  { %p578_p10 = scmp.ne.s32.totalorder %s48_s16, %s577_s18  ;;  %p583_p12 = scmp.lt.s32.totalorder %s577_s18, %s577_s18 }
  0x20   :  { %p584_p13 = por %p583_p12, %p582_p11 }
  0x22   :  { %p585_p0 = pnand %p584_p13, %p578_p10 }
  0x24   :  { %588 = shalt.err (!%p585_p0)
}
  0x25   :  { %53 = dma.hbm_to_vmem [thread:$0]  %s750_s3, 1024, %s48_s16, [#allocation6], %s638_s27, %s638_s27, %s639_s28  }
  0x26   :  { %s597_s0 = scalar_lea.vmem %s62_s1, 1024  ;;  %p602_p2 = scmp.lt.s32.totalorder %s62_s1, %s62_s1 }
  0x27   :  { %p598_p1 = scmp.ne.s32.totalorder %s62_s1, %s597_s0  ;;  %p603_p3 = scmp.lt.s32.totalorder %s597_s0, %s597_s0 }
  0x29   :  { %p604_p4 = por %p603_p3, %p602_p2 }
  0x2b   :  { %p605_p5 = pnand %p604_p4, %p598_p1 }
  0x2d   :  { %608 = shalt.err (!%p605_p5)
}
  0x2e   :  { %67 = dma.hbm_to_vmem [thread:$0]  %s752_s5, 1024, %s62_s1, [#allocation9], %s638_s27, %s638_s27, %s639_s28  }
  0x2f   :  { %629 = dma.done.wait [#allocation3], 256  }
  0x30   :  { %630 = vsyncadd [#allocation3], 4294967040 }
  0x31   :  { %631 = dma.done.wait [#allocation6], 1152  }
  0x32   :  { %632 = vsyncadd [#allocation6], 4294966144 }
  0x33   :  { %633 = dma.done.wait [#allocation9], 1024  }
  0x34   :  { %634 = vsyncadd [#allocation9], 4294966272  ;;  %v645_v0 = vmov 0.0   ;;  %vm646_vm0 = vmmov 0   ;;  %v512_v1 = vld [vmem:[#allocation5] sm:$0xff]   ;;  %v83_v2 = vld [vmem:[#allocation2] sm:$0xff] }
  0x35   :  { %455 = vmatprep.subr.bf16.mxu0 %v645_v0  ;;  %457 = vmatprep.mubr.msk.bf16.mxu0 %vm646_vm0, %v645_v0  ;;  %v84_v3 = vld [vmem:[#allocation2 + $0x8] sm:$0xff]  ;;  %vm101_vm1 = vcmask 130048   ;;  %v513_v5 = vld [vmem:[#allocation7 + $0x38] sm:$0xff]   ;;  %v515_v7 = vld [vmem:[#allocation7 + $0x28] sm:$0xff]   ;;  %s647_s26 = smov [#allocation10]  }
  0x36   :  { %461 = vmatprep.subr.bf16.mxu1 %v645_v0  ;;  %477 = vmatprep.mubr.msk.bf16.mxu1 %vm646_vm0, %v645_v0  ;;  %v85_v4 = vpack.c.bf16 %v84_v3, %v83_v2  ;;  %v514_v6 = vld [vmem:[#allocation7 + $0x30] sm:$0xff]   ;;  %v516_v8 = vld [vmem:[#allocation7 + $0x20] sm:$0xff]   ;;  %v517_v9 = vld [vmem:[#allocation7 + $0x18] sm:$0xff]   ;;  %s391_s29 = sshll.u32 %s647_s26, 4  ;;  %s392_s29 = int_to_ptr.vmem [resolvable:$true] %s391_s29 }
  0x37   :  { %456 = vmatpush3.bf16.msra.mxu0 %v512_v1  ;;  %462 = vmatpush3.bf16.msra.mxu1 %v513_v5  ;;  %v518_v10 = vld [vmem:[#allocation7 + $0x10] sm:$0xff]   ;;  %v519_v11 = vld [vmem:[#allocation7 + $0x8] sm:$0xff]   ;;  %v520_v12 = vld [vmem:[#allocation7] sm:$0xff]   ;;  %p614_p7 = scmp.lt.s32.totalorder %s392_s29, %s392_s29 }
  0x38   :  { %481 = vmatprep.subr.bf16.mxu0 %v645_v0  ;;  %463 = vmatprep.subr.bf16.mxu1 %v645_v0  ;;  %v521_v13 = vld [vmem:[#allocation8 + $0x38] sm:$0xff]   ;;  %v522_v14 = vld [vmem:[#allocation8 + $0x30] sm:$0xff]   ;;  %v523_v15 = vld [vmem:[#allocation8 + $0x28] sm:$0xff]  }
  0x39   :  { %v524_v16 = vld [vmem:[#allocation8 + $0x20] sm:$0xff]   ;;  %v525_v17 = vld [vmem:[#allocation8 + $0x18] sm:$0xff]   ;;  %v405_v18 = vld [vmem:[%s749_s2] ss:$0 sm:$0xff] }
  0x3a   :  { %458 = vmatmul.mubr.msk.bf16.vlgmr.msra.gmra.mxu0 %vm101_vm1, %v85_v4  ;;  %v526_v28 = vld [vmem:[#allocation8 + $0x10] sm:$0xff]   ;;  %v527_v29 = vld [vmem:[#allocation8 + $0x8] sm:$0xff]   ;;  %v528_v30 = vld [vmem:[#allocation8] sm:$0xff]  }
  0x3b   :  { %497 = vmatprep.mubr.msk.bf16.mxu0 %vm646_vm0, %v645_v0  ;;  %464 = vmatpush3.bf16.msra.mxu1 %v514_v6  ;;  %v408_v31 = vld [vmem:[%s751_s4] ss:$0 sm:$0xff]  ;;  %s609_s4 = scalar_lea.vmem %s392_s29, 128 }
  0x3c   :  { %465 = vmatprep.subr.bf16.mxu1 %v645_v0  ;;  %482 = vmatpush3.bf16.msra.mxu0 %v521_v13  ;;  %v417_v42 = vld [vmem:[%s753_s6] ss:$0 sm:$0xff]  ;;  %p610_p6 = scmp.ne.s32.totalorder %s392_s29, %s609_s4  ;;  %p615_p8 = scmp.lt.s32.totalorder %s609_s4, %s609_s4 }
  0x3d   :  { %483 = vmatprep.subr.bf16.mxu0 %v645_v0 }
  0x3e   :  { %p616_p9 = por %p615_p8, %p614_p7 }
  0x3f   :  { %466 = vmatpush3.bf16.msra.mxu1 %v515_v7 }
  0x40   :  { %467 = vmatprep.subr.bf16.mxu1 %v645_v0  ;;  %484 = vmatpush3.bf16.msra.mxu0 %v522_v14  ;;  %p617_p10 = pnand %p616_p9, %p610_p6 }
  0x41   :  { %485 = vmatprep.subr.bf16.mxu0 %v645_v0 }
  0x43   :  { %468 = vmatpush3.bf16.msra.mxu1 %v516_v8 }
  0x44   :  { %469 = vmatprep.subr.bf16.mxu1 %v645_v0  ;;  %486 = vmatpush3.bf16.msra.mxu0 %v523_v15 }
  0x45   :  { %487 = vmatprep.subr.bf16.mxu0 %v645_v0 }
  0x47   :  { %470 = vmatpush3.bf16.msra.mxu1 %v517_v9 }
  0x48   :  { %471 = vmatprep.subr.bf16.mxu1 %v645_v0  ;;  %488 = vmatpush3.bf16.msra.mxu0 %v524_v16 }
  0x49   :  { %489 = vmatprep.subr.bf16.mxu0 %v645_v0 }
  0x4b   :  { %472 = vmatpush3.bf16.msra.mxu1 %v518_v10 }
  0x4c   :  { %473 = vmatprep.subr.bf16.mxu1 %v645_v0  ;;  %490 = vmatpush3.bf16.msra.mxu0 %v525_v17 }
  0x4d   :  { %491 = vmatprep.subr.bf16.mxu0 %v645_v0 }
  0x4f   :  { %474 = vmatpush3.bf16.msra.mxu1 %v519_v11 }
  0x50   :  { %475 = vmatprep.subr.bf16.mxu1 %v645_v0  ;;  %492 = vmatpush3.bf16.msra.mxu0 %v526_v28 }
  0x51   :  { %493 = vmatprep.subr.bf16.mxu0 %v645_v0 }
  0x53   :  { %476 = vmatpush3.bf16.msra.mxu1 %v520_v12 }
  0x54   :  { %494 = vmatpush3.bf16.msra.mxu0 %v527_v29 }
  0x55   :  { %495 = vmatprep.subr.bf16.mxu0 %v645_v0 }
  0x58   :  { %496 = vmatpush3.bf16.msra.mxu0 %v528_v30 }
  0xfa   :  { %v139_v19 = vpop.f32.mrf.mxu0 }
  0xfb   :  { %v140_v21 = vadd.f32 %v405_v18, %v139_v19 }
  0xfc   :  { %v459_v20 = vpop.f32.mrf.mxu0 }
  0xfd   :  { %v146_v25 = vmax.f32 %v140_v21, 0.0 }
  0xfe   :  { %v142_v22 = vpop.f32.mrf.mxu0 }
  0xff   :  { %v143_v23 = vadd.f32 %v405_v18, %v142_v22 }
 0x100   :  { %v460_v24 = vpop.f32.mrf.mxu0 }
 0x101   :  { %v147_v26 = vmax.f32 %v143_v23, 0.0 }
 0x103   :  { %v148_v27 = vpack.c.bf16 %v147_v26, %v146_v25 }
 0x105   :  { %478 = vmatmul.mubr.bf16.vlgmr.msra.gmra.mxu1 %v148_v27 }
 0x1c5   :  { %v254_v32 = vpop.f32.mrf.mxu1 }
 0x1c6   :  { %v255_v34 = vadd.f32 %v408_v31, %v254_v32 }
 0x1c7   :  { %v479_v33 = vpop.f32.mrf.mxu1 }
 0x1c8   :  { %v261_v38 = vmax.f32 %v255_v34, 0.0 }
 0x1c9   :  { %v257_v35 = vpop.f32.mrf.mxu1 }
 0x1ca   :  { %v258_v36 = vadd.f32 %v408_v31, %v257_v35 }
 0x1cb   :  { %v480_v37 = vpop.f32.mrf.mxu1 }
 0x1cc   :  { %v262_v39 = vmax.f32 %v258_v36, 0.0 }
 0x1ce   :  { %v263_v40 = vpack.c.bf16 %v262_v39, %v261_v38 }
 0x1d0   :  { %498 = vmatmul.mubr.bf16.vlgmr.msra.gmra.mxu0 %v263_v40 }
 0x290   :  { %v369_v41 = vpop.f32.mrf.mxu0 }
 0x291   :  { %v370_v45 = vadd.f32 %v417_v42, %v369_v41 }
 0x292   :  { %v499_v43 = vpop.f32.mrf.mxu0 }
 0x294   :  { %v372_v44 = vpop.f32.mrf.mxu0 }
 0x295   :  { %v373_v46 = vadd.f32 %v417_v42, %v372_v44 }
 0x296   :  { %v500_v47 = vpop.f32.mrf.mxu0 }
 0x297   :  { %v433_v48 = vpack.c.bf16 %v373_v46, %v370_v45 }
 0x299   :  { %434 = vst [vmem:[#allocation10] sm:$0xff] %v433_v48  }
 0x29a   :  { %620 = shalt.err (!%p617_p10)
}
 0x29b   :  { %397 = dma.vmem_to_hbm [thread:$0]  %s392_s29, 128, %s754_s7, [#allocation4], %s638_s27, %s638_s27, %s639_s28  }
 0x29c   :  { %635 = dma.done.wait [#allocation4], 128  }
 0x29d   :  { %636 = vsyncadd [#allocation4], 4294967168 }
 0x29e   :  { %401 = vsyncpa [#allocation3], 1 }
 0x29f   :  { %402 = vsyncpa [#allocation6], 1 }
 0x2a0   :  { %403 = vsyncpa [#allocation9], 1 }
 0x2a1   :  { %404 = vsyncpa [#allocation4], 1 }

</bundles_post_ra>
